<compile_context>
chip_gen: v7x
topology: tpu7x:2x2x1
jax: 0.10.0
libtpu: 0.0.40
codegen_flags: <defaults>
</compile_context>

<pallas_src>
import functools

import jax
import jax.numpy as jnp
from jax.experimental import pallas as pl
from jax.experimental.pallas import tpu as pltpu

_Z_DIM = 256 + 128  # cat([z2, z3], dim=1)


def _mlp_kernel(x_ref,
                w1_ref, b1_ref,
                w2_ref, b2_ref,
                w3_ref, b3_ref,
                w4_ref, b4_ref,
                w5_ref, b5_ref,
                out_ref, feat_ref=None):
    """5-layer MLP for one (TB, num_features) batch tile."""
    x = x_ref[...]

    # layer_1 + ReLU
    h = jnp.dot(x, w1_ref[...], preferred_element_type=jnp.float32) + b1_ref[...]
    h = jnp.maximum(h, 0.0)

    # layer_2 (z2, pre-ReLU feature) + ReLU
    z2 = jnp.dot(h, w2_ref[...], preferred_element_type=jnp.float32) + b2_ref[...]
    if feat_ref is not None:
        feat_ref[:, 0:256] = z2          # lane-aligned store (offset 0, width 256)
    h = jnp.maximum(z2, 0.0)

    # layer_3 (z3, pre-ReLU feature) + ReLU
    z3 = jnp.dot(h, w3_ref[...], preferred_element_type=jnp.float32) + b3_ref[...]
    if feat_ref is not None:
        feat_ref[:, 256:384] = z3        # lane-aligned store (offset 256, width 128)
    h = jnp.maximum(z3, 0.0)

    # layer_4 + ReLU (output width zero-padded 64 -> 128; pad lanes stay 0)
    h = jnp.dot(h, w4_ref[...], preferred_element_type=jnp.float32) + b4_ref[...]
    h = jnp.maximum(h, 0.0)

    # layer_5 (logits, padded to a multiple of 128 lanes, no activation)
    out_ref[...] = jnp.dot(h, w5_ref[...], preferred_element_type=jnp.float32) + b5_ref[...]


def _round_up(n, m):
    return pl.cdiv(n, m) * m


def _generation_budget():
    """(tb_max, vmem_limit_bytes) by TPU generation (conservative when unknown)."""
    kind = ""
    try:
        kind = jax.devices()[0].device_kind.lower()
    except Exception:
        pass
    if "v5" in kind or "v6" in kind:
        return 4096, 64 * 1024 * 1024     # 128 MiB physical VMEM: biggest tiles
    # v7x has only 64 MiB physical VMEM -> smaller tile + conservative limit.
    return 2048, 44 * 1024 * 1024


def _choose_batch_tiling(batch, tb_max):
    """Pick tile count first, then tile size, so padding waste is < 8*n rows
    and the grid has >= 2 steps (v7x megacore) whenever the batch allows."""
    n = pl.cdiv(batch, tb_max)
    if n < 2 and batch > 8:
        n = 2
    tb = _round_up(pl.cdiv(batch, n), 8)
    return tb, tb * n


@functools.partial(jax.jit, static_argnames=("extract_features",))
def class_nnet_forward(x, params, extract_features=False):
    """Forward pass of ClassNNet (use_dropout=False path)."""
    batch, num_features = x.shape
    num_classes = params["w5"].shape[1]

    tb_max, vmem_limit = _generation_budget()

    # Lane-dense padding widths (all padding is exact zeros -> numerics unchanged).
    n_pad = _round_up(max(num_classes, 128), 128)   # logits width
    k4 = 128                                        # layer-4 width 64 -> 128

    # Biases as explicit (1, out) rows (robust to 1-D bias inits).
    b = {i: params[f"b{i}"].reshape(1, -1) for i in range(1, 6)}

    w4 = jnp.pad(params["w4"], ((0, 0), (0, k4 - params["w4"].shape[1])))
    b4 = jnp.pad(b[4], ((0, 0), (0, k4 - b[4].shape[1])))
    w5 = jnp.pad(params["w5"], ((0, k4 - params["w5"].shape[0]),
                                (0, n_pad - num_classes)))
    b5 = jnp.pad(b[5], ((0, 0), (0, n_pad - num_classes)))

    # Cap the batch tile by a VMEM footprint estimate: double-buffered x/out
    # tiles + single-buffered live intermediates, at ~60% of the scoped limit.
    bytes_per_row = 4 * (2 * num_features + 2 * n_pad + 256 + 256 + 128 + k4)
    if extract_features:
        bytes_per_row += 4 * 2 * _Z_DIM
    tb_cap = max(8, ((int(0.6 * vmem_limit) // bytes_per_row) // 8) * 8)

    tb, padded_batch = _choose_batch_tiling(batch, min(tb_max, tb_cap))
    if padded_batch != batch:
        x = jnp.pad(x, ((0, padded_batch - batch), (0, 0)))

    def resident(arr):
        # Whole-array block whose index never changes -> DMA'd into VMEM once.
        # Single-buffered: a second pipeline buffer for it is dead VMEM.
        return pl.BlockSpec(arr.shape, lambda i: (0, 0),
                            pipeline_mode=pl.Buffered(1))

    args = (
        x,
        params["w1"], b[1],
        params["w2"], b[2],
        params["w3"], b[3],
        w4, b4,
        w5, b5,
    )
    in_specs = [pl.BlockSpec((tb, num_features), lambda i: (i, 0))]
    in_specs += [resident(a) for a in args[1:]]

    out_shape = [jax.ShapeDtypeStruct((padded_batch, n_pad), jnp.float32)]
    out_specs = [pl.BlockSpec((tb, n_pad), lambda i: (i, 0))]
    if extract_features:
        out_shape.append(jax.ShapeDtypeStruct((padded_batch, _Z_DIM), jnp.float32))
        out_specs.append(pl.BlockSpec((tb, _Z_DIM), lambda i: (i, 0)))

    flops = 2 * padded_batch * (num_features * 256 + 256 * 256 + 256 * 128
                                + 128 * k4 + k4 * n_pad)
    bytes_accessed = 4 * (padded_batch * (num_features + n_pad
                                          + (_Z_DIM if extract_features else 0))
                          + sum(int(a.size) for a in args[1:]))

    results = pl.pallas_call(
        _mlp_kernel,
        out_shape=tuple(out_shape),
        grid=(padded_batch // tb,),
        in_specs=in_specs,
        out_specs=tuple(out_specs),
        compiler_params=pltpu.CompilerParams(
            dimension_semantics=("parallel",),   # megacore sharding on v7x
            vmem_limit_bytes=vmem_limit,
        ),
        cost_estimate=pl.CostEstimate(
            flops=flops, transcendentals=0, bytes_accessed=bytes_accessed),
    )(*args)

    logits = results[0][:batch, :num_classes]
    if extract_features:
        feats = results[1][:batch, :]
        return logits, feats
    return logits


def init_params(key, num_features, num_classes):
    """Deterministic parameter init (PyTorch-Linear-style uniform bounds)."""
    dims = [(num_features, 256), (256, 256), (256, 128), (128, 64), (64, num_classes)]
    params = {}
    for i, (fan_in, fan_out) in enumerate(dims, start=1):
        key, kw, kb = jax.random.split(key, 3)
        bound = 1.0 / jnp.sqrt(float(fan_in))
        # stored as (in, out) so the kernel uses x @ W + b
        params[f"w{i}"] = jax.random.uniform(
            kw, (fan_in, fan_out), jnp.float32, minval=-bound, maxval=bound)
        params[f"b{i}"] = jax.random.uniform(
            kb, (1, fan_out), jnp.float32, minval=-bound, maxval=bound)
    return params


def _reference_forward(x, params):
    """Plain-JAX reference of the same forward for a correctness check."""
    h = jnp.maximum(x @ params["w1"] + params["b1"], 0.0)
    z2 = h @ params["w2"] + params["b2"]
    h = jnp.maximum(z2, 0.0)
    z3 = h @ params["w3"] + params["b3"]
    h = jnp.maximum(z3, 0.0)
    h = jnp.maximum(h @ params["w4"] + params["b4"], 0.0)
    logits = h @ params["w5"] + params["b5"]
    return logits, jnp.concatenate([z2, z3], axis=1)


if __name__ == "__main__":
    num_features = 32
    num_classes = 10
    batch = 16   # > 8 rows so the grid has 2 steps (exercises the tiled path)

    key = jax.random.PRNGKey(0)
    key, kx = jax.random.split(key)
    x = jax.random.normal(kx, (batch, num_features), jnp.float32)
    params = init_params(key, num_features, num_classes)

    # extract_features=True variant (logits + cat([z2, z3], 1))
    logits, feats = class_nnet_forward(x, params, extract_features=True)
    # extract_features=False variant (no feature compute / HBM writeback)
    logits_only = class_nnet_forward(x, params, extract_features=False)
    jax.block_until_ready((logits, feats, logits_only))

    ref_logits, ref_feats = _reference_forward(x, params)
    assert logits.shape == (batch, num_classes)
    assert logits_only.shape == (batch, num_classes)
    assert feats.shape == (batch, _Z_DIM)
    assert jnp.allclose(logits, ref_logits, atol=1e-4, rtol=1e-4)
    assert jnp.allclose(logits_only, ref_logits, atol=1e-4, rtol=1e-4)
    assert jnp.allclose(feats, ref_feats, atol=1e-4, rtol=1e-4)

    print("KERNEL_OK")
</pallas_src>

<mosaic_0001>
module attributes {stable_mosaic.version = 11 : i64} {
  func.func @_mlp_kernel(%arg0: i32, %arg1: memref<8x32xf32, #tpu.memory_space<vmem>>, %arg2: memref<32x256xf32, #tpu.memory_space<vmem>>, %arg3: memref<1x256xf32, #tpu.memory_space<vmem>>, %arg4: memref<256x256xf32, #tpu.memory_space<vmem>>, %arg5: memref<1x256xf32, #tpu.memory_space<vmem>>, %arg6: memref<256x128xf32, #tpu.memory_space<vmem>>, %arg7: memref<1x128xf32, #tpu.memory_space<vmem>>, %arg8: memref<128x128xf32, #tpu.memory_space<vmem>>, %arg9: memref<1x128xf32, #tpu.memory_space<vmem>>, %arg10: memref<128x128xf32, #tpu.memory_space<vmem>>, %arg11: memref<1x128xf32, #tpu.memory_space<vmem>>, %arg12: memref<8x128xf32, #tpu.memory_space<vmem>>, %arg13: memref<8x384xf32, #tpu.memory_space<vmem>>) attributes {dimension_semantics = [#tpu.dimension_semantics<parallel>], iteration_bounds = array<i64: 2>, scalar_prefetch = 0 : i64, scratch_operands = 0 : i64, tpu.core_type = #tpu.core_type<tc>, window_params = [{transform_indices = @transform_0, window_bounds = array<i64: 8, 32>}, {pipeline_mode = #tpu.pipeline_mode<synchronous>, transform_indices = @transform_1, window_bounds = array<i64: 32, 256>}, {pipeline_mode = #tpu.pipeline_mode<synchronous>, transform_indices = @transform_2, window_bounds = array<i64: 1, 256>}, {pipeline_mode = #tpu.pipeline_mode<synchronous>, transform_indices = @transform_3, window_bounds = array<i64: 256, 256>}, {pipeline_mode = #tpu.pipeline_mode<synchronous>, transform_indices = @transform_4, window_bounds = array<i64: 1, 256>}, {pipeline_mode = #tpu.pipeline_mode<synchronous>, transform_indices = @transform_5, window_bounds = array<i64: 256, 128>}, {pipeline_mode = #tpu.pipeline_mode<synchronous>, transform_indices = @transform_6, window_bounds = array<i64: 1, 128>}, {pipeline_mode = #tpu.pipeline_mode<synchronous>, transform_indices = @transform_7, window_bounds = array<i64: 128, 128>}, {pipeline_mode = #tpu.pipeline_mode<synchronous>, transform_indices = @transform_8, window_bounds = array<i64: 1, 128>}, {pipeline_mode = #tpu.pipeline_mode<synchronous>, transform_indices = @transform_9, window_bounds = array<i64: 128, 128>}, {pipeline_mode = #tpu.pipeline_mode<synchronous>, transform_indices = @transform_10, window_bounds = array<i64: 1, 128>}, {transform_indices = @transform_11, window_bounds = array<i64: 8, 128>}, {transform_indices = @transform_12, window_bounds = array<i64: 8, 384>}]} {
    %c0 = arith.constant 0 : index
    %c0_0 = arith.constant 0 : index
    %0 = vector.load %arg1[%c0, %c0_0] : memref<8x32xf32, #tpu.memory_space<vmem>>, vector<8x32xf32>
    %c0_1 = arith.constant 0 : index
    %c0_2 = arith.constant 0 : index
    %1 = vector.load %arg2[%c0_1, %c0_2] : memref<32x256xf32, #tpu.memory_space<vmem>>, vector<32x256xf32>
    %cst = arith.constant dense<0.000000e+00> : vector<8x256xf32>
    %2 = tpu.matmul %0, %1, %cst {dimension_numbers = #tpu.dot_dimension_numbers<[1], [0], [0], [1], [0, 0, 1, 1], [], []>} : vector<8x32xf32>, vector<32x256xf32>, vector<8x256xf32> -> vector<8x256xf32>
    %c0_3 = arith.constant 0 : index
    %c0_4 = arith.constant 0 : index
    %3 = vector.load %arg3[%c0_3, %c0_4] : memref<1x256xf32, #tpu.memory_space<vmem>>, vector<1x256xf32>
    %4 = vector.broadcast %3 : vector<1x256xf32> to vector<8x256xf32>
    %5 = arith.addf %2, %4 : vector<8x256xf32>
    %cst_5 = arith.constant 0.000000e+00 : f32
    %6 = vector.broadcast %cst_5 : f32 to vector<8x256xf32>
    %7 = arith.maximumf %5, %6 : vector<8x256xf32>
    %c0_6 = arith.constant 0 : index
    %c0_7 = arith.constant 0 : index
    %8 = vector.load %arg4[%c0_6, %c0_7] : memref<256x256xf32, #tpu.memory_space<vmem>>, vector<256x256xf32>
    %cst_8 = arith.constant dense<0.000000e+00> : vector<8x256xf32>
    %9 = tpu.matmul %7, %8, %cst_8 {dimension_numbers = #tpu.dot_dimension_numbers<[1], [0], [0], [1], [0, 0, 1, 1], [], []>} : vector<8x256xf32>, vector<256x256xf32>, vector<8x256xf32> -> vector<8x256xf32>
    %c0_9 = arith.constant 0 : index
    %c0_10 = arith.constant 0 : index
    %10 = vector.load %arg5[%c0_9, %c0_10] : memref<1x256xf32, #tpu.memory_space<vmem>>, vector<1x256xf32>
    %11 = vector.broadcast %10 : vector<1x256xf32> to vector<8x256xf32>
    %12 = arith.addf %9, %11 : vector<8x256xf32>
    %c0_11 = arith.constant 0 : index
    %c0_12 = arith.constant 0 : index
    %13 = vector.load %arg13[%c0_11, %c0_12] : memref<8x384xf32, #tpu.memory_space<vmem>>, vector<8x256xf32>
    tpu.vector_store %arg13[%c0_11, %c0_12], %12 {strides = array<i32>} : memref<8x384xf32, #tpu.memory_space<vmem>>, vector<8x256xf32>,
    %cst_13 = arith.constant 0.000000e+00 : f32
    %14 = vector.broadcast %cst_13 : f32 to vector<8x256xf32>
    %15 = arith.maximumf %12, %14 : vector<8x256xf32>
    %c0_14 = arith.constant 0 : index
    %c0_15 = arith.constant 0 : index
    %16 = vector.load %arg6[%c0_14, %c0_15] : memref<256x128xf32, #tpu.memory_space<vmem>>, vector<256x128xf32>
    %cst_16 = arith.constant dense<0.000000e+00> : vector<8x128xf32>
    %17 = tpu.matmul %15, %16, %cst_16 {dimension_numbers = #tpu.dot_dimension_numbers<[1], [0], [0], [1], [0, 0, 1, 1], [], []>} : vector<8x256xf32>, vector<256x128xf32>, vector<8x128xf32> -> vector<8x128xf32>
    %c0_17 = arith.constant 0 : index
    %c0_18 = arith.constant 0 : index
    %18 = vector.load %arg7[%c0_17, %c0_18] : memref<1x128xf32, #tpu.memory_space<vmem>>, vector<1x128xf32>
    %19 = vector.broadcast %18 : vector<1x128xf32> to vector<8x128xf32>
    %20 = arith.addf %17, %19 : vector<8x128xf32>
    %c0_19 = arith.constant 0 : index
    %c256 = arith.constant 256 : index
    %21 = vector.load %arg13[%c0_19, %c256] : memref<8x384xf32, #tpu.memory_space<vmem>>, vector<8x128xf32>
    tpu.vector_store %arg13[%c0_19, %c256], %20 {strides = array<i32>} : memref<8x384xf32, #tpu.memory_space<vmem>>, vector<8x128xf32>,
    %cst_20 = arith.constant 0.000000e+00 : f32
    %22 = vector.broadcast %cst_20 : f32 to vector<8x128xf32>
    %23 = arith.maximumf %20, %22 : vector<8x128xf32>
    %c0_21 = arith.constant 0 : index
    %c0_22 = arith.constant 0 : index
    %24 = vector.load %arg8[%c0_21, %c0_22] : memref<128x128xf32, #tpu.memory_space<vmem>>, vector<128x128xf32>
    %cst_23 = arith.constant dense<0.000000e+00> : vector<8x128xf32>
    %25 = tpu.matmul %23, %24, %cst_23 {dimension_numbers = #tpu.dot_dimension_numbers<[1], [0], [0], [1], [0, 0, 1, 1], [], []>} : vector<8x128xf32>, vector<128x128xf32>, vector<8x128xf32> -> vector<8x128xf32>
    %c0_24 = arith.constant 0 : index
    %c0_25 = arith.constant 0 : index
    %26 = vector.load %arg9[%c0_24, %c0_25] : memref<1x128xf32, #tpu.memory_space<vmem>>, vector<1x128xf32>
    %27 = vector.broadcast %26 : vector<1x128xf32> to vector<8x128xf32>
    %28 = arith.addf %25, %27 : vector<8x128xf32>
    %cst_26 = arith.constant 0.000000e+00 : f32
    %29 = vector.broadcast %cst_26 : f32 to vector<8x128xf32>
    %30 = arith.maximumf %28, %29 : vector<8x128xf32>
    %c0_27 = arith.constant 0 : index
    %c0_28 = arith.constant 0 : index
    %31 = vector.load %arg10[%c0_27, %c0_28] : memref<128x128xf32, #tpu.memory_space<vmem>>, vector<128x128xf32>
    %cst_29 = arith.constant dense<0.000000e+00> : vector<8x128xf32>
    %32 = tpu.matmul %30, %31, %cst_29 {dimension_numbers = #tpu.dot_dimension_numbers<[1], [0], [0], [1], [0, 0, 1, 1], [], []>} : vector<8x128xf32>, vector<128x128xf32>, vector<8x128xf32> -> vector<8x128xf32>
    %c0_30 = arith.constant 0 : index
    %c0_31 = arith.constant 0 : index
    %33 = vector.load %arg11[%c0_30, %c0_31] : memref<1x128xf32, #tpu.memory_space<vmem>>, vector<1x128xf32>
    %34 = vector.broadcast %33 : vector<1x128xf32> to vector<8x128xf32>
    %35 = arith.addf %32, %34 : vector<8x128xf32>
    %c0_32 = arith.constant 0 : index
    %c0_33 = arith.constant 0 : index
    %36 = vector.load %arg12[%c0_32, %c0_33] : memref<8x128xf32, #tpu.memory_space<vmem>>, vector<8x128xf32>
    tpu.vector_store %arg12[%c0_32, %c0_33], %35 {strides = array<i32>} : memref<8x128xf32, #tpu.memory_space<vmem>>, vector<8x128xf32>,
    return
  }
  func.func @transform_0(%arg0: i32) -> (i32, i32) {
    %c0_i32 = arith.constant 0 : i32
    %c0_i32_0 = arith.constant 0 : i32
    return %arg0, %c0_i32 : i32, i32
  }
  func.func @transform_1(%arg0: i32) -> (i32, i32) {
    %c0_i32 = arith.constant 0 : i32
    %c0_i32_0 = arith.constant 0 : i32
    %c0_i32_1 = arith.constant 0 : i32
    return %c0_i32, %c0_i32_0 : i32, i32
  }
  func.func @transform_2(%arg0: i32) -> (i32, i32) {
    %c0_i32 = arith.constant 0 : i32
    %c0_i32_0 = arith.constant 0 : i32
    %c0_i32_1 = arith.constant 0 : i32
    return %c0_i32, %c0_i32_0 : i32, i32
  }
  func.func @transform_3(%arg0: i32) -> (i32, i32) {
    %c0_i32 = arith.constant 0 : i32
    %c0_i32_0 = arith.constant 0 : i32
    %c0_i32_1 = arith.constant 0 : i32
    return %c0_i32, %c0_i32_0 : i32, i32
  }
  func.func @transform_4(%arg0: i32) -> (i32, i32) {
    %c0_i32 = arith.constant 0 : i32
    %c0_i32_0 = arith.constant 0 : i32
    %c0_i32_1 = arith.constant 0 : i32
    return %c0_i32, %c0_i32_0 : i32, i32
  }
  func.func @transform_5(%arg0: i32) -> (i32, i32) {
    %c0_i32 = arith.constant 0 : i32
    %c0_i32_0 = arith.constant 0 : i32
    %c0_i32_1 = arith.constant 0 : i32
    return %c0_i32, %c0_i32_0 : i32, i32
  }
  func.func @transform_6(%arg0: i32) -> (i32, i32) {
    %c0_i32 = arith.constant 0 : i32
    %c0_i32_0 = arith.constant 0 : i32
    %c0_i32_1 = arith.constant 0 : i32
    return %c0_i32, %c0_i32_0 : i32, i32
  }
  func.func @transform_7(%arg0: i32) -> (i32, i32) {
    %c0_i32 = arith.constant 0 : i32
    %c0_i32_0 = arith.constant 0 : i32
    %c0_i32_1 = arith.constant 0 : i32
    return %c0_i32, %c0_i32_0 : i32, i32
  }
  func.func @transform_8(%arg0: i32) -> (i32, i32) {
    %c0_i32 = arith.constant 0 : i32
    %c0_i32_0 = arith.constant 0 : i32
    %c0_i32_1 = arith.constant 0 : i32
    return %c0_i32, %c0_i32_0 : i32, i32
  }
  func.func @transform_9(%arg0: i32) -> (i32, i32) {
    %c0_i32 = arith.constant 0 : i32
    %c0_i32_0 = arith.constant 0 : i32
    %c0_i32_1 = arith.constant 0 : i32
    return %c0_i32, %c0_i32_0 : i32, i32
  }
  func.func @transform_10(%arg0: i32) -> (i32, i32) {
    %c0_i32 = arith.constant 0 : i32
    %c0_i32_0 = arith.constant 0 : i32
    %c0_i32_1 = arith.constant 0 : i32
    return %c0_i32, %c0_i32_0 : i32, i32
  }
  func.func @transform_11(%arg0: i32) -> (i32, i32) {
    %c0_i32 = arith.constant 0 : i32
    %c0_i32_0 = arith.constant 0 : i32
    return %arg0, %c0_i32 : i32, i32
  }
  func.func @transform_12(%arg0: i32) -> (i32, i32) {
    %c0_i32 = arith.constant 0 : i32
    %c0_i32_0 = arith.constant 0 : i32
    return %arg0, %c0_i32 : i32, i32
  }
}

</mosaic_0001>

<bundles_post_ra>
// kernel: class_nnet_forward.1
= control target key start
LH: loop header
LB: loop body
LE: loop exit
PB: predicated region body
PF: predicated region fallthrough
CT: control target
= control target key end

     0   :  { %s2206_s0 = inlined_call_operand.vmem [shape: f32[16,32], index: 0, kind: input, shape index: {}]   ;;  %s2207_s1 = inlined_call_operand.vmem [shape: f32[32,256], index: 1, kind: input, shape index: {}]   ;;  %s2208_s2 = inlined_call_operand.vmem [shape: f32[1,256], index: 2, kind: input, shape index: {}]   ;;  %s2209_s3 = inlined_call_operand.vmem [shape: f32[256,256], index: 3, kind: input, shape index: {}]   ;;  %s2210_s4 = inlined_call_operand.vmem [shape: f32[1,256], index: 4, kind: input, shape index: {}]   ;;  %s2211_s5 = inlined_call_operand.hbm [shape: f32[256,128], index: 5, kind: input, shape index: {}]   ;;  %s2212_s6 = inlined_call_operand.vmem [shape: f32[1,128], index: 6, kind: input, shape index: {}]   ;;  %s2213_s7 = inlined_call_operand.vmem [shape: f32[128,128], index: 7, kind: input, shape index: {}]   ;;  %s2214_s8 = inlined_call_operand.vmem [shape: f32[1,128], index: 8, kind: input, shape index: {}]   ;;  %s2215_s9 = inlined_call_operand.vmem [shape: f32[128,128], index: 9, kind: input, shape index: {}]   ;;  %s2216_s10 = inlined_call_operand.vmem [shape: f32[1,128], index: 10, kind: input, shape index: {}]   ;;  %s2217_s11 = inlined_call_operand.hbm [shape: f32[16,128], index: 11, kind: output, shape index: {0}]   ;;  %s2218_s12 = inlined_call_operand.hbm [shape: f32[16,384], index: 12, kind: output, shape index: {1}]  }
   0x1   :  { %2223 = sst [smem:[#allocation13_spill]] %s2206_s0 }
   0x2   :  { %2224 = sst [smem:[#allocation14_spill]] %s2211_s5 }
   0x3   :  { %18 = vsyncpa [#allocation3], 0 }
   0x4   :  { %19 = vsyncpa [#allocation4], 0 }
   0x5   :  { %21 = vsyncpa [#allocation4 + $0x1], 0 }
   0x6   :  { %22 = vsyncpa [#allocation7], 0 }
   0x7   :  { %24 = vsyncpa [#allocation7 + $0x1], 0  ;;  %s1690_s21 = smov 0   ;;  %s1692_s22 = smov 0  }
   0x8   :  { %s1694_s23 = smov 0   ;;  %s1696_s24 = smov 0  }
   0x9 LB: > { %2225 = sst [smem:[#allocation11_spill]] %s1611_s23  ;;  %s1711_s25 = sadd.s32 4294967295, %s1615_s24   ;;  %s1615_s24 = sphi %s1696_s24, %s2242_s24   ;;  %s1611_s23 = sphi %s1694_s23, %s2239_s23   ;;  %s1607_s22 = sphi %s1692_s22, %s2241_s22   ;;  %s1603_s21 = sphi %s1690_s21, %s2240_s21  }
   0xa   : > { %s1119_s26 = sadd.s32 4294967294, %s1615_s24   ;;  %s1715_s27 = sadd.s32 1, %s1615_s24  }
   0xb   : > { %s273_s28 = sadd.s32 1, %s1611_s23  ;;  %s270_s29 = ssub.s32 %s1615_s24, %s1715_s27 }
   0xc   : > { %p283_p0 = scmp.ne.s32.totalorder %s1611_s23, %s1607_s22  ;;  %p271_p1 = scmp.eq.s32.totalorder %s270_s29, 0 }
   0xd   : > { %p284_p2 = scmp.eq.s32.totalorder %s1711_s25, 1  ;;  %p289_p3 = scmp.ne.s32.totalorder %s1607_s22, %s1603_s21 }
   0xe   : > { %p290_p4 = scmp.eq.s32.totalorder %s1119_s26, 1  ;;  %p1120_p7 = scmp.ge.s32.totalorder %s1615_s24, 1 }
   0xf   : > { %s1726_s30 = scalar_select %p271_p1, %s1611_s23, %s273_s28  }
  0x10   : > { %p1728_p5 = por %p284_p2, %p283_p0  ;;  %p1732_p6 = por %p290_p4, %p289_p3 }
  0x11   : > { %2226 = sst [smem:[#allocation12_spill]] %s1726_s30  ;;  %p323_p8 = scmp.lt.s32.totalorder %s1615_s24, 3 }
  0x12   : > { %s2227_s13 = scalar_select %p1728_p5, 1, 0 }
  0x13   : > { %s2228_s14 = scalar_select %p1732_p6, 1, 0 }
  0x14   : > { %p2220_p9 = scmp.eq.s32.totalorder %s1711_s25, 0  ;;  %p1739_p10 = pnand %p1120_p7, %p323_p8 }
  0x15   : > { %s1617_s16 = smov [#allocation2]   ;;  %s2231_s5 = sld [smem:[#allocation14_spill]] }
  0x16   : > { %s2229_s15 = scalar_select %p1739_p10, 1, 0 }
  0x17   : > { %s347_s17 = sshll.u32 %s1617_s16, 4  ;;  %p1437_p11 = pneg %p1739_p10  ;;  %s348_s17 = int_to_ptr.vmem [resolvable:$true] %s347_s17 }
  0x19   : > { %p1747_p12 = pnand %p2220_p9, %p1437_p11 }
  0x1b   : > { %s1489_s26 = scalar_lea.hbm %s2231_s5, 4096  ;;  %p1491_p0 = pneg %p1747_p12 }
  0x1c   : > { %p1490_p13 = scmp.ne.s32.totalorder %s2231_s5, %s1489_s26  ;;  %p1496_p3 = scmp.lt.u32.totalorder %s1489_s26, %s2231_s5 }
  0x1e   : > { %p1492_p1 = pnand %p1491_p0, %p1490_p13 }
  0x20   : > { %p1493_p2 = pneg %p1492_p1 }
  0x22   : > { %p1498_p4 = pnand %p1496_p3, %p1493_p2 }
  0x24   : > { %1501 = shalt.err (!%p1498_p4)
}
  0x25   : > { %s1502_s23 = scalar_lea.vmem %s348_s17, 4096  ;;  %p1510_p9 = scmp.lt.s32.totalorder %s348_s17, %s348_s17 }
  0x26   : > { %p1503_p7 = scmp.ne.s32.totalorder %s348_s17, %s1502_s23  ;;  %p1511_p6 = scmp.lt.s32.totalorder %s1502_s23, %s1502_s23 }
  0x28   : > { %p1505_p8 = pnand %p1503_p7, %p1491_p0  ;;  %p1512_p5 = por %p1511_p6, %p1510_p9 }
  0x2a   : > { %p1506_p11 = pneg %p1505_p8 }
  0x2c   : > { %p1513_p10 = pnand %p1512_p5, %p1506_p11 }
  0x2e   : > { %1516 = shalt.err (!%p1513_p10)
}
  0x2f   : > { %s1618_s19 = smov 128   ;;  %s1619_s20 = smov 8  }
  0x30   : > { %1440 = dma.hbm_to_vmem [thread:$0]  (!%p1747_p12), %s2231_s5, 4096, %s348_s17, [#allocation3], %s1618_s19, %s1618_s19, %s1619_s20  }
  0x31   : > { %p2232_p13 = scmp.ne.s32.totalorder %s2229_s15, 0 }
  0x32   : > { %p2233_p1 = scmp.eq.s32.totalorder (!%p2232_p13), %s1711_s25, 0 }
  0x33   : > { %385 = sbr.rel (%p2232_p13) target bundleno = 1169 (0x491), region = 64 }
  0x3a   : > { %1590 = dma.done.wait (%p2233_p1), [#allocation3], 4096   ;;  %p2234_p0 = pmov %p2233_p1 }
  0x3b   : > { %v1620_v0 = vmov 0.0   ;;  %p431_p5 = scmp.lt.s32.totalorder %s1711_s25, 1  ;;  %v437_v1 = vld [vmem:[%s2207_s1 + $0x8] sm:$0xff]  ;;  %v439_v2 = vld [vmem:[%s2207_s1 + $0x18] sm:$0xff]  ;;  %v436_v3 = vld [vmem:[%s2207_s1] sm:$0xff]  ;;  %s2235_s0 = sld [smem:[#allocation13_spill]] }
  0x3c   : > { %1592 = vsyncadd (%p2234_p0), [#allocation3], 4294963200  ;;  %524 = vmatprep.mubr.f32.mxu0 %v1620_v0  ;;  %v1275_v4 = vpack.c.bf16 %v439_v2, %v437_v1  ;;  %v438_v5 = vld [vmem:[%s2207_s1 + $0x10] sm:$0xff]  ;;  %v441_v6 = vld [vmem:[%s2207_s1 + $0x28] sm:$0xff]  ;;  %vm456_vm0 = vcmask 261120   ;;  %s2001_s28 = sand.u32 1, %s1607_s22  }
  0x3d   : > { %s432_s23 = scalar_select %p431_p5, %s1711_s25, 1  ;;  %v443_v7 = vld [vmem:[%s2207_s1 + $0x38] sm:$0xff]  ;;  %v1277_v8 = vpack.c.bf16 %v438_v5, %v436_v3  ;;  %v440_v10 = vld [vmem:[%s2207_s1 + $0x20] sm:$0xff]  ;;  %v442_v11 = vld [vmem:[%s2207_s1 + $0x30] sm:$0xff]  ;;  %vm1622_vm1 = vmmov 0  }
  0x3e   : > { %v1279_v9 = vpack.c.bf16 %v443_v7, %v441_v6  ;;  %1276 = vmatprep.subr.bf16.mxu0 %v1275_v4  ;;  %v534_v12 = vld [vmem:[%s2209_s3 + $0x8] sm:$0xff]  ;;  %v536_v13 = vld [vmem:[%s2209_s3 + $0x18] sm:$0xff]  ;;  %v533_v14 = vld [vmem:[%s2209_s3] sm:$0xff]  ;;  %v1281_v15 = vpack.c.bf16 %v442_v11, %v440_v10  ;;  %s1427_s18 = smul.u32 24, %s2001_s28  ;;  %s989_s15 = scalar_lea.sflag [#allocation7], %s2001_s28 }
  0x3f   : > { %s1126_s16 = sshll.u32 %s432_s23, 3  ;;  %1278 = vmatpush1.bf16.msra.mxu0 %v1277_v8  ;;  %v1283_v16 = vpack.c.bf16 %v536_v13, %v534_v12  ;;  %v535_v17 = vld [vmem:[%s2209_s3 + $0x10] sm:$0xff]  ;;  %v538_v18 = vld [vmem:[%s2209_s3 + $0x28] sm:$0xff]  ;;  %v540_v19 = vld [vmem:[%s2209_s3 + $0x38] sm:$0xff]  ;;  %s1428_s30 = smul.u32 384, %s1711_s25 }
  0x40   : > { %1280 = vmatprep.subr.bf16.mxu0 %v1279_v9  ;;  %v1285_v20 = vpack.c.bf16 %v535_v17, %v533_v14  ;;  %v1287_v21 = vpack.c.bf16 %v540_v19, %v538_v18  ;;  %v537_v22 = vld [vmem:[%s2209_s3 + $0x20] sm:$0xff]  ;;  %v539_v23 = vld [vmem:[%s2209_s3 + $0x30] sm:$0xff]  ;;  %v542_v24 = vld [vmem:[%s2209_s3 + $0x48] sm:$0xff]  ;;  %s2013_s26 = scalar_lea.vmem [#allocation6], %s1427_s18  ;;  %p2236_p9 = scmp.ne.s32.totalorder %s2227_s13, 0 }
  0x41   : > { %s434_s29 = scalar_lea.vmem %s2235_s0, %s1126_s16  ;;  %1284 = vmatprep.subr.bf16.mxu1 %v1283_v16  ;;  %v544_v25 = vld [vmem:[%s2209_s3 + $0x58] sm:$0xff]  ;;  %v1289_v26 = vpack.c.bf16 %v539_v23, %v537_v22  ;;  %v541_v29 = vld [vmem:[%s2209_s3 + $0x40] sm:$0xff]  ;;  %v543_v30 = vld [vmem:[%s2209_s3 + $0x50] sm:$0xff]  ;;  %s2134_s23 = scalar_lea.hbm %s2218_s12, %s1428_s30 }
  0x42   : > { %1286 = vmatpush1.bf16.msra.mxu1 %v1285_v20  ;;  %v435_v27 = vld [vmem:[%s434_s29] sm:$0xff]  ;;  %v1291_v28 = vpack.c.bf16 %v544_v25, %v542_v24  ;;  %v546_v31 = vld [vmem:[%s2209_s3 + $0x68] sm:$0xff]  ;;  %v548_v32 = vld [vmem:[%s2209_s3 + $0x78] sm:$0xff]  ;;  %v1293_v33 = vpack.c.bf16 %v543_v30, %v541_v29  ;;  %s1016_s29 = sshll.u32 %s2013_s26, 4  ;;  %s1623_s16 = smov [#allocation6]   ;;  %s1017_s29 = int_to_ptr.vmem [resolvable:$true] %s1016_s29 }
  0x43   : > { %1282 = vmatpush1.bf16.msra.mxu0 %v1281_v15  ;;  %1288 = vmatprep.subr.bf16.mxu1 %v1287_v21  ;;  %v1295_v34 = vpack.c.bf16 %v548_v32, %v546_v31  ;;  %v545_v35 = vld [vmem:[%s2209_s3 + $0x60] sm:$0xff]  ;;  %v547_v36 = vld [vmem:[%s2209_s3 + $0x70] sm:$0xff]  ;;  %v550_v37 = vld [vmem:[%s2209_s3 + $0x88] sm:$0xff]  ;;  %s1517_s19 = scalar_lea.vmem %s1017_s29, 384  ;;  %s1521_s20 = sshll.u32 %s1623_s16, 4  ;;  %s1522_s20 = int_to_ptr.vmem [resolvable:$false] %s1521_s20 }
  0x44   : > { %v552_v38 = vld [vmem:[%s2209_s3 + $0x98] sm:$0xff]  ;;  %v1297_v39 = vpack.c.bf16 %v547_v36, %v545_v35  ;;  %v549_v41 = vld [vmem:[%s2209_s3 + $0x80] sm:$0xff]  ;;  %v551_v42 = vld [vmem:[%s2209_s3 + $0x90] sm:$0xff]  ;;  %p1518_p6 = scmp.ne.s32.totalorder %s1017_s29, %s1517_s19  ;;  %s1523_s5 = scalar_lea.vmem %s1522_s20, 768 }
  0x45   : > { %v1299_v40 = vpack.c.bf16 %v552_v38, %v550_v37  ;;  %v554_v43 = vld [vmem:[%s2209_s3 + $0xa8] sm:$0xff]  ;;  %v556_v44 = vld [vmem:[%s2209_s3 + $0xb8] sm:$0xff]  ;;  %v1301_v45 = vpack.c.bf16 %v551_v42, %v549_v41  ;;  %v553_v47 = vld [vmem:[%s2209_s3 + $0xa0] sm:$0xff]  ;;  %p1524_p2 = scmp.lt.s32.totalorder %s1017_s29, %s1522_s20  ;;  %p1525_p3 = scmp.lt.s32.totalorder %s1523_s5, %s1517_s19 }
  0x46   : > { %1127 = vmatmul.mubr.msk.f32.vlgmr.msra.gmra.mrb[0].mxu0 %vm456_vm0, %v435_v27  ;;  %1290 = vmatpush1.bf16.msra.mxu1 %v1289_v26  ;;  %v1303_v46 = vpack.c.bf16 %v556_v44, %v554_v43  ;;  %v555_v48 = vld [vmem:[%s2209_s3 + $0xb0] sm:$0xff]  ;;  %v558_v49 = vld [vmem:[%s2209_s3 + $0xc8] sm:$0xff]  ;;  %v560_v50 = vld [vmem:[%s2209_s3 + $0xd8] sm:$0xff]  ;;  %p1519_p10 = pnand %p1518_p6, %p2236_p9 }
  0x47   : > { %1292 = vmatprep.subr.bf16.mxu1 %v1291_v28  ;;  %v1305_v51 = vpack.c.bf16 %v555_v48, %v553_v47  ;;  %v1307_v52 = vpack.c.bf16 %v560_v50, %v558_v49  ;;  %v557_v53 = vld [vmem:[%s2209_s3 + $0xc0] sm:$0xff]  ;;  %v559_v54 = vld [vmem:[%s2209_s3 + $0xd0] sm:$0xff]  ;;  %v562_v55 = vld [vmem:[%s2209_s3 + $0xe8] sm:$0xff]  ;;  %p1526_p4 = por %p1525_p3, %p1524_p2 }
  0x48   : > { %v564_v56 = vld [vmem:[%s2209_s3 + $0xf8] sm:$0xff]  ;;  %v1309_v57 = vpack.c.bf16 %v559_v54, %v557_v53  ;;  %v561_v59 = vld [vmem:[%s2209_s3 + $0xe0] sm:$0xff]  ;;  %v563_v60 = vld [vmem:[%s2209_s3 + $0xf0] sm:$0xff]  ;;  %p1520_p12 = pneg %p1519_p10 }
  0x49   : > { %v1311_v58 = vpack.c.bf16 %v564_v56, %v562_v55  ;;  %v566_v61 = vld [vmem:[%s2209_s3 + $0x108] sm:$0xff]  ;;  %v568_v62 = vld [vmem:[%s2209_s3 + $0x118] sm:$0xff]  ;;  %v1313_v63 = vpack.c.bf16 %v563_v60, %v561_v59  ;;  %v565_v2 = vld [vmem:[%s2209_s3 + $0x100] sm:$0xff] }
  0x4a   : > { %1294 = vmatpush1.bf16.msra.mxu1 %v1293_v33  ;;  %v1315_v1 = vpack.c.bf16 %v568_v62, %v566_v61  ;;  %v567_v3 = vld [vmem:[%s2209_s3 + $0x110] sm:$0xff]  ;;  %v570_v4 = vld [vmem:[%s2209_s3 + $0x128] sm:$0xff]  ;;  %v572_v5 = vld [vmem:[%s2209_s3 + $0x138] sm:$0xff]  ;;  %p1527_p7 = pnand %p1526_p4, %p1520_p12 }
  0x4b   : > { %1296 = vmatprep.subr.bf16.mxu1 %v1295_v34  ;;  %v1317_v6 = vpack.c.bf16 %v567_v3, %v565_v2  ;;  %v1319_v7 = vpack.c.bf16 %v572_v5, %v570_v4  ;;  %v569_v8 = vld [vmem:[%s2209_s3 + $0x120] sm:$0xff]  ;;  %v571_v9 = vld [vmem:[%s2209_s3 + $0x130] sm:$0xff]  ;;  %v574_v10 = vld [vmem:[%s2209_s3 + $0x148] sm:$0xff] }
  0x4c   : > { %v576_v11 = vld [vmem:[%s2209_s3 + $0x158] sm:$0xff]  ;;  %v1321_v12 = vpack.c.bf16 %v571_v9, %v569_v8  ;;  %v573_v14 = vld [vmem:[%s2209_s3 + $0x140] sm:$0xff]  ;;  %v575_v15 = vld [vmem:[%s2209_s3 + $0x150] sm:$0xff] }
  0x4d   : > { %v1323_v13 = vpack.c.bf16 %v576_v11, %v574_v10  ;;  %v578_v16 = vld [vmem:[%s2209_s3 + $0x168] sm:$0xff]  ;;  %v580_v17 = vld [vmem:[%s2209_s3 + $0x178] sm:$0xff]  ;;  %v1325_v18 = vpack.c.bf16 %v575_v15, %v573_v14  ;;  %v577_v20 = vld [vmem:[%s2209_s3 + $0x160] sm:$0xff] }
  0x4e   : > { %1298 = vmatpush1.bf16.msra.mxu1 %v1297_v39  ;;  %v1327_v19 = vpack.c.bf16 %v580_v17, %v578_v16  ;;  %v579_v21 = vld [vmem:[%s2209_s3 + $0x170] sm:$0xff]  ;;  %v582_v22 = vld [vmem:[%s2209_s3 + $0x188] sm:$0xff]  ;;  %v584_v23 = vld [vmem:[%s2209_s3 + $0x198] sm:$0xff] }
  0x4f   : > { %1300 = vmatprep.subr.bf16.mxu1 %v1299_v40  ;;  %v1329_v24 = vpack.c.bf16 %v579_v21, %v577_v20  ;;  %v1331_v25 = vpack.c.bf16 %v584_v23, %v582_v22  ;;  %v581_v26 = vld [vmem:[%s2209_s3 + $0x180] sm:$0xff]  ;;  %v583_v27 = vld [vmem:[%s2209_s3 + $0x190] sm:$0xff]  ;;  %v586_v28 = vld [vmem:[%s2209_s3 + $0x1a8] sm:$0xff]  ;;  %v446_v23 = vlaneseq }
  0x50   : > { %v588_v29 = vld [vmem:[%s2209_s3 + $0x1b8] sm:$0xff]  ;;  %v1333_v30 = vpack.c.bf16 %v583_v27, %v581_v26  ;;  %v585_v32 = vld [vmem:[%s2209_s3 + $0x1a0] sm:$0xff]  ;;  %v587_v33 = vld [vmem:[%s2209_s3 + $0x1b0] sm:$0xff] }
  0x51   : > { %v1335_v31 = vpack.c.bf16 %v588_v29, %v586_v28  ;;  %v590_v34 = vld [vmem:[%s2209_s3 + $0x1c8] sm:$0xff]  ;;  %v592_v35 = vld [vmem:[%s2209_s3 + $0x1d8] sm:$0xff]  ;;  %v1337_v36 = vpack.c.bf16 %v587_v33, %v585_v32  ;;  %v589_v38 = vld [vmem:[%s2209_s3 + $0x1c0] sm:$0xff] }
  0x52   : > { %1302 = vmatpush1.bf16.msra.mxu1 %v1301_v45  ;;  %v1339_v37 = vpack.c.bf16 %v592_v35, %v590_v34  ;;  %v591_v39 = vld [vmem:[%s2209_s3 + $0x1d0] sm:$0xff]  ;;  %v594_v41 = vld [vmem:[%s2209_s3 + $0x1e8] sm:$0xff]  ;;  %v596_v42 = vld [vmem:[%s2209_s3 + $0x1f8] sm:$0xff] }
  0x53   : > { %1304 = vmatprep.subr.bf16.mxu1 %v1303_v46  ;;  %v1341_v40 = vpack.c.bf16 %v591_v39, %v589_v38  ;;  %v1343_v43 = vpack.c.bf16 %v596_v42, %v594_v41  ;;  %v593_v44 = vld [vmem:[%s2209_s3 + $0x1e0] sm:$0xff]  ;;  %v595_v45 = vld [vmem:[%s2209_s3 + $0x1f0] sm:$0xff]  ;;  %v701_v48 = vld [vmem:[#allocation2 + $0x88] sm:$0xff] }
  0x54   : > { %v1345_v46 = vpack.c.bf16 %v595_v45, %v593_v44  ;;  %v700_v47 = vld [vmem:[#allocation2 + $0x80] sm:$0xff]  ;;  %v703_v53 = vld [vmem:[#allocation2 + $0x98] sm:$0xff]  ;;  %v686_v56 = vld [vmem:[#allocation2 + $0x10] sm:$0xff]  ;;  %v1621_v45 = vmov 0.0|0.0  }
  0x55   : > { %v684_v49 = vld [vmem:[#allocation2] sm:$0xff]  ;;  %v1347_v50 = vpack.c.bf16 %v701_v48, %v700_v47  ;;  %v705_v59 = vld [vmem:[#allocation2 + $0xa8] sm:$0xff]  ;;  %v707_v2 = vld [vmem:[#allocation2 + $0xb8] sm:$0xff] }
  0x56   : > { %1306 = vmatpush1.bf16.msra.mxu1 %v1305_v51  ;;  %v685_v51 = vld [vmem:[#allocation2 + $0x8] sm:$0xff]  ;;  %v688_v62 = vld [vmem:[#allocation2 + $0x20] sm:$0xff]  ;;  %v690_v5 = vld [vmem:[#allocation2 + $0x30] sm:$0xff] }
  0x57   : > { %1308 = vmatprep.subr.bf16.mxu1 %v1307_v52  ;;  %v702_v52 = vld [vmem:[#allocation2 + $0x90] sm:$0xff]  ;;  %v1349_v54 = vpack.c.bf16 %v685_v51, %v684_v49  ;;  %1348 = vmatprep.subr.bf16.mxu0 %v1347_v50  ;;  %v709_v8 = vld [vmem:[#allocation2 + $0xc8] sm:$0xff]  ;;  %v692_v11 = vld [vmem:[#allocation2 + $0x40] sm:$0xff] }
  0x58   : > { %v1351_v55 = vpack.c.bf16 %v703_v53, %v702_v52  ;;  %v711_v14 = vld [vmem:[#allocation2 + $0xd8] sm:$0xff]  ;;  %v694_v17 = vld [vmem:[#allocation2 + $0x50] sm:$0xff]  ;;  %v713_v20 = vld [vmem:[#allocation2 + $0xe8] sm:$0xff] }
  0x59   : > { %1350 = vmatpush3.bf16.msra.mxu0 %v1349_v54  ;;  %v444_v26 = vld [vmem:[%s2208_s2] sm:$0x3]  ;;  %v714_v39 = vld [vmem:[#allocation2 + $0xf0] sm:$0xff]  ;;  %v796_v53 = vld [vmem:[%s2213_s7 + $0x8] sm:$0xff] }
  0x5a   : > { %1310 = vmatpush1.bf16.msra.mxu1 %v1309_v57  ;;  %v687_v57 = vld [vmem:[#allocation2 + $0x18] sm:$0xff]  ;;  %1352 = vmatprep.subr.bf16.mxu0 %v1351_v55  ;;  %v698_v42 = vld [vmem:[#allocation2 + $0x70] sm:$0xff]  ;;  %v795_v52 = vld [vmem:[%s2213_s7] sm:$0xff] }
  0x5b   : > { %1312 = vmatprep.subr.bf16.mxu1 %v1311_v58  ;;  %v704_v58 = vld [vmem:[#allocation2 + $0xa0] sm:$0xff]  ;;  %v1353_v60 = vpack.c.bf16 %v687_v57, %v686_v56  ;;  %v1380_v56 = vpack.c.bf16 %v796_v53, %v795_v52 }
  0x5c   : > { %v1355_v61 = vpack.c.bf16 %v705_v59, %v704_v58  ;;  %v797_v58 = vld [vmem:[%s2213_s7 + $0x10] sm:$0xff]  ;;  %v798_v59 = vld [vmem:[%s2213_s7 + $0x18] sm:$0xff] }
  0x5d   : > { %1354 = vmatpush3.bf16.msra.mxu0 %v1353_v60  ;;  %v1383_v60 = vpack.c.bf16 %v798_v59, %v797_v58 }
  0x5e   : > { %1314 = vmatpush1.bf16.msra.mxu1 %v1313_v63  ;;  %v689_v63 = vld [vmem:[#allocation2 + $0x28] sm:$0xff]  ;;  %1356 = vmatprep.subr.bf16.mxu0 %v1355_v61  ;;  %v799_v61 = vld [vmem:[%s2213_s7 + $0x20] sm:$0xff] }
  0x5f   : > { %1316 = vmatprep.subr.bf16.mxu1 %v1315_v1  ;;  %v706_v1 = vld [vmem:[#allocation2 + $0xb0] sm:$0xff]  ;;  %v1357_v3 = vpack.c.bf16 %v689_v63, %v688_v62  ;;  %v800_v62 = vld [vmem:[%s2213_s7 + $0x28] sm:$0xff] }
  0x60   : > { %v1359_v4 = vpack.c.bf16 %v707_v2, %v706_v1  ;;  %v1386_v63 = vpack.c.bf16 %v800_v62, %v799_v61  ;;  %v801_v1 = vld [vmem:[%s2213_s7 + $0x30] sm:$0xff]  ;;  %v802_v2 = vld [vmem:[%s2213_s7 + $0x38] sm:$0xff] }
  0x61   : > { %1358 = vmatpush3.bf16.msra.mxu0 %v1357_v3  ;;  %v1389_v3 = vpack.c.bf16 %v802_v2, %v801_v1 }
  0x62   : > { %1318 = vmatpush1.bf16.msra.mxu1 %v1317_v6  ;;  %v691_v6 = vld [vmem:[#allocation2 + $0x38] sm:$0xff]  ;;  %1360 = vmatprep.subr.bf16.mxu0 %v1359_v4  ;;  %v803_v4 = vld [vmem:[%s2213_s7 + $0x40] sm:$0xff] }
  0x63   : > { %1320 = vmatprep.subr.bf16.mxu1 %v1319_v7  ;;  %v708_v7 = vld [vmem:[#allocation2 + $0xc0] sm:$0xff]  ;;  %v1361_v9 = vpack.c.bf16 %v691_v6, %v690_v5  ;;  %v804_v5 = vld [vmem:[%s2213_s7 + $0x48] sm:$0xff] }
  0x64   : > { %v1363_v10 = vpack.c.bf16 %v709_v8, %v708_v7  ;;  %v1392_v6 = vpack.c.bf16 %v804_v5, %v803_v4  ;;  %v805_v7 = vld [vmem:[%s2213_s7 + $0x50] sm:$0xff]  ;;  %v806_v8 = vld [vmem:[%s2213_s7 + $0x58] sm:$0xff] }
  0x65   : > { %1362 = vmatpush3.bf16.msra.mxu0 %v1361_v9  ;;  %v1395_v9 = vpack.c.bf16 %v806_v8, %v805_v7 }
  0x66   : > { %1322 = vmatpush1.bf16.msra.mxu1 %v1321_v12  ;;  %v693_v12 = vld [vmem:[#allocation2 + $0x48] sm:$0xff]  ;;  %1364 = vmatprep.subr.bf16.mxu0 %v1363_v10  ;;  %v807_v10 = vld [vmem:[%s2213_s7 + $0x60] sm:$0xff] }
  0x67   : > { %1324 = vmatprep.subr.bf16.mxu1 %v1323_v13  ;;  %v710_v13 = vld [vmem:[#allocation2 + $0xd0] sm:$0xff]  ;;  %v1365_v15 = vpack.c.bf16 %v693_v12, %v692_v11  ;;  %v808_v11 = vld [vmem:[%s2213_s7 + $0x68] sm:$0xff] }
  0x68   : > { %v1367_v16 = vpack.c.bf16 %v711_v14, %v710_v13  ;;  %v1398_v12 = vpack.c.bf16 %v808_v11, %v807_v10  ;;  %v809_v13 = vld [vmem:[%s2213_s7 + $0x70] sm:$0xff]  ;;  %v810_v14 = vld [vmem:[%s2213_s7 + $0x78] sm:$0xff] }
  0x69   : > { %1366 = vmatpush3.bf16.msra.mxu0 %v1365_v15  ;;  %v1401_v15 = vpack.c.bf16 %v810_v14, %v809_v13 }
  0x6a   : > { %1326 = vmatpush1.bf16.msra.mxu1 %v1325_v18  ;;  %v695_v18 = vld [vmem:[#allocation2 + $0x58] sm:$0xff]  ;;  %1368 = vmatprep.subr.bf16.mxu0 %v1367_v16  ;;  %v889_v16 = vld [vmem:[%s2215_s9] sm:$0xff] }
  0x6b   : > { %1328 = vmatprep.subr.bf16.mxu1 %v1327_v19  ;;  %v712_v19 = vld [vmem:[#allocation2 + $0xe0] sm:$0xff]  ;;  %v1369_v21 = vpack.c.bf16 %v695_v18, %v694_v17  ;;  %v890_v17 = vld [vmem:[%s2215_s9 + $0x8] sm:$0xff]  ;;  %v891_v18 = vld [vmem:[%s2215_s9 + $0x10] sm:$0xff] }
  0x6c   : > { %v1371_v22 = vpack.c.bf16 %v713_v20, %v712_v19  ;;  %v1404_v19 = vpack.c.bf16 %v890_v17, %v889_v16  ;;  %v892_v20 = vld [vmem:[%s2215_s9 + $0x18] sm:$0xff] }
  0x6d   : > { %1370 = vmatpush3.bf16.msra.mxu0 %v1369_v21  ;;  %v1407_v21 = vpack.c.bf16 %v892_v20, %v891_v18 }
  0x6e   : > { %1330 = vmatpush1.bf16.msra.mxu1 %v1329_v24  ;;  %1372 = vmatprep.subr.bf16.mxu0 %v1371_v22  ;;  %v447_v24 = vshrl.u32 %v446_v23, 7  ;;  %v894_v22 = vld [vmem:[%s2215_s9 + $0x28] sm:$0xff] }
  0x6f   : > { %1332 = vmatprep.subr.bf16.mxu1 %v1331_v25 }
  0x70   : > { %v448_v25 = vsub.s32 0, %v447_v24  ;;  %v452_v27 = vsub.s32 1, %v447_v24  ;;  %v895_v24 = vld [vmem:[%s2215_s9 + $0x30] sm:$0xff] }
  0x72   : > { %1334 = vmatpush1.bf16.msra.mxu1 %v1333_v30  ;;  %v449_v28 = vrot.slane %v444_v26, %v448_v25  ;;  %v453_v29 = vrot.slane %v444_v26, %v452_v27 }
  0x73   : > { %1336 = vmatprep.subr.bf16.mxu1 %v1335_v31 }
  0x76   : > { %1338 = vmatpush1.bf16.msra.mxu1 %v1337_v36  ;;  %v696_v36 = vld [vmem:[#allocation2 + $0x60] sm:$0xff] }
  0x77   : > { %1340 = vmatprep.subr.bf16.mxu1 %v1339_v37  ;;  %v697_v37 = vld [vmem:[#allocation2 + $0x68] sm:$0xff] }
  0x78   : > { %v1373_v38 = vpack.c.bf16 %v697_v37, %v696_v36  ;;  %v1128_v37 = vld [vmem:[%s2212_s6] ss:$0 sm:$0xff] }
  0x7a   : > { %1342 = vmatpush1.bf16.msra.mxu1 %v1341_v40  ;;  %1374 = vmatpush3.bf16.msra.mxu0 %v1373_v38  ;;  %v715_v40 = vld [vmem:[#allocation2 + $0xf8] sm:$0xff] }
  0x7b   : > { %1344 = vmatprep.subr.bf16.mxu1 %v1343_v43  ;;  %v1375_v41 = vpack.c.bf16 %v715_v40, %v714_v39  ;;  %v699_v43 = vld [vmem:[#allocation2 + $0x78] sm:$0xff] }
  0x7c   : > { %v1377_v44 = vpack.c.bf16 %v699_v43, %v698_v42  ;;  %v903_v42 = vld [vmem:[%s2215_s9 + $0x70] sm:$0xff]  ;;  %v904_v43 = vld [vmem:[%s2215_s9 + $0x78] sm:$0xff] }
  0x7d   : > { %1376 = vmatprep.subr.bf16.mxu0 %v1375_v41 }
  0x7e   : > { %1346 = vmatpush1.bf16.msra.mxu1 %v1345_v46  ;;  %1378 = vmatpush3.bf16.msra.mxu0 %v1377_v44  ;;  %v597_v46 = vld [vmem:[%s2210_s4] sm:$0x3]  ;;  %v1425_v44 = vpack.c.bf16 %v904_v43, %v903_v42 }
  0x7f   : > { %1379 = vmatprep.subr.bf16.mxu0 %v1621_v45  ;;  %1403 = vmatprep.subr.bf16.mxu1 %v1621_v45  ;;  %v602_v47 = vrot.slane %v597_v46, %v448_v25  ;;  %v606_v48 = vrot.slane %v597_v46, %v452_v27  ;;  %v896_v25 = vld [vmem:[%s2215_s9 + $0x38] sm:$0xff]  ;;  %v897_v27 = vld [vmem:[%s2215_s9 + $0x40] sm:$0xff] }
  0x80   : > { %v1413_v26 = vpack.c.bf16 %v896_v25, %v895_v24 }
 0x119   : > { %v526_v30 = vpop.f32.mrb[0].mxu0 }
 0x11a   : > { %v527_v31 = vadd.f32 %v526_v30, %v449_v28  ;;  %v528_v32 = vpop.f32.mrb[1].mxu0  ;;  %v898_v28 = vld [vmem:[%s2215_s9 + $0x48] sm:$0xff]  ;;  %v899_v30 = vld [vmem:[%s2215_s9 + $0x50] sm:$0xff] }
 0x11b   : > { %v529_v33 = vadd.f32 %v528_v32, %v453_v29  ;;  %v1416_v29 = vpack.c.bf16 %v898_v28, %v897_v27 }
 0x11c   : > { %v531_v35 = vmax.f32 %v527_v31, 0.0  ;;  %v900_v31 = vld [vmem:[%s2215_s9 + $0x58] sm:$0xff] }
 0x11d   : > { %v532_v34 = vmax.f32 %v529_v33, 0.0  ;;  %v1419_v32 = vpack.c.bf16 %v900_v31, %v899_v30  ;;  %v901_v33 = vld [vmem:[%s2215_s9 + $0x60] sm:$0xff] }
 0x11f   : > { %673 = vmatprep.mubr.f32.mxu1 %v532_v34  ;;  %v902_v34 = vld [vmem:[%s2215_s9 + $0x68] sm:$0xff] }
 0x120   : > { %674 = vmatmul.mubr.f32.vlgmr.msra.gmra.mrb[0].mxu1 %v531_v35  ;;  %v1422_v35 = vpack.c.bf16 %v902_v34, %v901_v33 }
 0x121   : > { %1272 = vmatprep.mubr.msk.f32.mxu1 %vm1622_vm1, %v1620_v0  ;;  %1405 = vmatpush3.bf16.msra.mxu1 %v1404_v19 }
 0x122   : > { %1406 = vmatprep.subr.bf16.mxu1 %v1621_v45 }
 0x125   : > { %1408 = vmatpush3.bf16.msra.mxu1 %v1407_v21 }
 0x126   : > { %1409 = vmatprep.subr.bf16.mxu1 %v1621_v45 }
 0x1f3   : > { %v675_v49 = vpop.f32.mrb[0].mxu1 }
 0x1f4   : > { %v676_v50 = vadd.f32 %v675_v49, %v602_v47  ;;  %v677_v51 = vpop.f32.mrb[1].mxu1 }
 0x1f5   : > { %v678_v54 = vadd.f32 %v677_v51, %v606_v48 }
 0x1f6   : > { %680 = vst [vmem:[%s2013_s26] sm:$0xff] %v676_v50  ;;  %v682_v57 = vmax.f32 %v676_v50, 0.0 }
 0x1f7   : > { %681 = vst [vmem:[%s2013_s26 + $0x8] sm:$0xff] %v678_v54  ;;  %v683_v55 = vmax.f32 %v678_v54, 0.0 }
 0x1f9   : > { %787 = vmatprep.mubr.f32.mxu0 %v683_v55 }
 0x1fa   : > { %788 = vmatmul.mubr.f32.vlgmr.msra.gmra.mrb[2].mxu0 %v682_v57 }
 0x1fb   : > { %1381 = vmatpush3.bf16.msra.mxu0 %v1380_v56  ;;  %1237 = vmatprep.mubr.msk.f32.mxu0 %vm1622_vm1, %v1620_v0  ;;  %v893_v0 = vld [vmem:[%s2215_s9 + $0x20] sm:$0xff] }
 0x1fc   : > { %1382 = vmatprep.subr.bf16.mxu0 %v1621_v45  ;;  %v1410_v23 = vpack.c.bf16 %v894_v22, %v893_v0 }
 0x1fe   : > { %1411 = vmatpush3.bf16.msra.mxu1 %v1410_v23 }
 0x1ff   : > { %1384 = vmatpush3.bf16.msra.mxu0 %v1383_v60  ;;  %1412 = vmatprep.subr.bf16.mxu1 %v1621_v45 }
 0x200   : > { %1385 = vmatprep.subr.bf16.mxu0 %v1621_v45 }
 0x202   : > { %1414 = vmatpush3.bf16.msra.mxu1 %v1413_v26 }
 0x203   : > { %1387 = vmatpush3.bf16.msra.mxu0 %v1386_v63  ;;  %1415 = vmatprep.subr.bf16.mxu1 %v1621_v45 }
 0x204   : > { %1388 = vmatprep.subr.bf16.mxu0 %v1621_v45 }
 0x206   : > { %1417 = vmatpush3.bf16.msra.mxu1 %v1416_v29 }
 0x207   : > { %1390 = vmatpush3.bf16.msra.mxu0 %v1389_v3  ;;  %1418 = vmatprep.subr.bf16.mxu1 %v1621_v45 }
 0x208   : > { %1391 = vmatprep.subr.bf16.mxu0 %v1621_v45 }
 0x20a   : > { %1420 = vmatpush3.bf16.msra.mxu1 %v1419_v32 }
 0x20b   : > { %1393 = vmatpush3.bf16.msra.mxu0 %v1392_v6  ;;  %1421 = vmatprep.subr.bf16.mxu1 %v1621_v45 }
 0x20c   : > { %1394 = vmatprep.subr.bf16.mxu0 %v1621_v45 }
 0x20e   : > { %1423 = vmatpush3.bf16.msra.mxu1 %v1422_v35 }
 0x20f   : > { %1396 = vmatpush3.bf16.msra.mxu0 %v1395_v9  ;;  %1424 = vmatprep.subr.bf16.mxu1 %v1621_v45 }
 0x210   : > { %1397 = vmatprep.subr.bf16.mxu0 %v1621_v45 }
 0x212   : > { %1426 = vmatpush3.bf16.msra.mxu1 %v1425_v44 }
 0x213   : > { %1399 = vmatpush3.bf16.msra.mxu0 %v1398_v12 }
 0x214   : > { %1400 = vmatprep.subr.bf16.mxu0 %v1621_v45  ;;  %v1129_v45 = vld [vmem:[%s2214_s8] ss:$0 sm:$0xff] }
 0x217   : > { %1402 = vmatpush3.bf16.msra.mxu0 %v1401_v15 }
 0x2cd   : > { %v1168_v36 = vpop.f32.mrb[2].mxu0 }
 0x2ce   : > { %v1169_v38 = vpop.f32.mrb[3].mxu0 }
 0x2cf   : > { %v1170_v39 = vadd.f32 %v1169_v38, %v1168_v36 }
 0x2d1   : > { %v790_v40 = vadd.f32 %v1170_v39, %v1128_v37 }
 0x2d3   : > { %793 = vst [vmem:[%s2013_s26 + $0x10] sm:$0xff] %v790_v40  ;;  %v794_v41 = vmax.f32 %v790_v40, 0.0 }
 0x2d5   : > { %1238 = vmatmul.mubr.f32.vlgmr.msra.gmra.mrb[4].mxu0 %v794_v41 }
 0x3a8   : > { %v884_v46 = vpop.f32.mrb[4].mxu0 }
 0x3a9   : > { %v885_v47 = vadd.f32 %v1129_v45, %v884_v46  ;;  %v1239_v48 = vpop.f32.mrb[5].mxu0 }
 0x3ab   : > { %v888_v49 = vmax.f32 %v885_v47, 0.0 }
 0x3ad   : > { %1273 = vmatmul.mubr.f32.vlgmr.msra.gmra.mrb[2].mxu1 %v888_v49 }
 0x3ae   : > { %1530 = shalt.err (!%p1527_p7)
}
 0x3af   : > { %s1531_s26 = scalar_lea.hbm %s2134_s23, 384  ;;  %s1535_s17 = scalar_lea.hbm %s2218_s12, 768 }
 0x3b0   : > { %p1532_p8 = scmp.ne.s32.totalorder %s2134_s23, %s1531_s26  ;;  %p1536_p1 = scmp.lt.u32.totalorder %s2134_s23, %s2218_s12 }
 0x3b1   : > { %p1537_p0 = scmp.lt.u32.totalorder %s1535_s17, %s1531_s26  ;;  %p1539_p6 = scmp.lt.u32.totalorder %s1531_s26, %s2134_s23 }
 0x3b2   : > { %p1533_p11 = pnand %p1532_p8, %p2236_p9 }
 0x3b3   : > { %p1538_p5 = por %p1537_p0, %p1536_p1 }
 0x3b4   : > { %p1534_p13 = pneg %p1533_p11 }
 0x3b5   : > { %p1540_p10 = por %p1539_p6, %p1538_p5 }
 0x3b7   : > { %p1541_p12 = pnand %p1540_p10, %p1534_p13 }
 0x3b9   : > { %1544 = shalt.err (!%p1541_p12)
}
 0x3ba   : > { %1434 = dma.vmem_to_hbm [thread:$0]  (%p2236_p9), %s1017_s29, 384, %s2134_s23, %s989_s15   ;;  %v1130_v50 = vld [vmem:[%s2216_s10] ss:$0 sm:$0xff] }
 0x3bb   : > { %s1125_s19 = sshll.u32 %s2001_s28, 3  ;;  %s1132_s18 = sshll.u32 %s1711_s25, 7 }
 0x3bc   : > { %s423_s17 = scalar_lea.vmem [#allocation5], %s1125_s19  ;;  %s2163_s0 = scalar_lea.hbm %s2217_s11, %s1132_s18 }
 0x3bd   : > { %s1002_s16 = sshll.u32 %s423_s17, 4  ;;  %s984_s23 = scalar_lea.sflag [#allocation4], %s2001_s28  ;;  %s2165_s16 = int_to_ptr.vmem [resolvable:$true] %s1002_s16 }
 0x3be   : > { %s1545_s29 = scalar_lea.vmem %s2165_s16, 128  ;;  %s1624_s25 = smov [#allocation5]  }
 0x3bf   : > { %p1546_p2 = scmp.ne.s32.totalorder %s2165_s16, %s1545_s29  ;;  %s1549_s15 = sshll.u32 %s1624_s25, 4  ;;  %s1550_s15 = int_to_ptr.vmem [resolvable:$false] %s1549_s15 }
 0x3c0   : > { %s1551_s19 = scalar_lea.vmem %s1550_s15, 256  ;;  %p1552_p7 = scmp.lt.s32.totalorder %s2165_s16, %s1550_s15 }
 0x3c1   : > { %p1547_p3 = pnand %p1546_p2, %p2236_p9  ;;  %p1553_p8 = scmp.lt.s32.totalorder %s1551_s19, %s1545_s29 }
 0x3c3   : > { %p1548_p4 = pneg %p1547_p3  ;;  %p1554_p11 = por %p1553_p8, %p1552_p7 }
 0x3c5   : > { %p1555_p13 = pnand %p1554_p11, %p1548_p4 }
 0x480   : > { %v978_v51 = vpop.f32.mrb[2].mxu1 }
 0x481   : > { %v979_v52 = vadd.f32 %v1130_v50, %v978_v51  ;;  %v1274_v53 = vpop.f32.mrb[3].mxu1 }
 0x483   : > { %982 = vst [vmem:[%s423_s17] sm:$0xff] %v979_v52 }
 0x484   : > { %1558 = shalt.err (!%p1555_p13)
}
 0x485   : > { %s1559_s28 = scalar_lea.hbm %s2163_s0, 128  ;;  %s1563_s18 = scalar_lea.hbm %s2217_s11, 256 }
 0x486   : > { %p1560_p1 = scmp.ne.s32.totalorder %s2163_s0, %s1559_s28  ;;  %p1564_p6 = scmp.lt.u32.totalorder %s2163_s0, %s2217_s11 }
 0x487   : > { %p1565_p10 = scmp.lt.u32.totalorder %s1563_s18, %s1559_s28  ;;  %p1567_p2 = scmp.lt.u32.totalorder %s1559_s28, %s2163_s0 }
 0x488   : > { %p1561_p0 = pnand %p1560_p1, %p2236_p9 }
 0x489   : > { %p1566_p12 = por %p1565_p10, %p1564_p6 }
 0x48a   : > { %p1562_p5 = pneg %p1561_p0 }
 0x48b   : > { %p1568_p3 = por %p1567_p2, %p1566_p12 }
 0x48d   : > { %p1569_p4 = pnand %p1568_p3, %p1562_p5 }
 0x48f   : > { %1572 = shalt.err (!%p1569_p4)
}
 0x490   : > { %1433 = dma.vmem_to_hbm [thread:$0]  (%p2236_p9), %s2165_s16, 128, %s2163_s0, %s984_s23  }
 0x491 PF: > { %p1450_p7 = scmp.ge.s32.totalorder %s1615_s24, 2  ;;  %s1028_s20 = sand.u32 1, %s1603_s21  }
 0x492   : > { %p2237_p8 = scmp.ne.s32.totalorder %s2228_s14, 0  ;;  %s1029_s29 = scalar_lea.sflag [#allocation4], %s1028_s20 }
 0x494   : > { %p1442_p11 = pnand %p1450_p7, %p2237_p8 }
 0x496   : > { %1594 = dma.done.wait (!%p1442_p11), %s1029_s29, 128  }
 0x497   : > { %1596 = vsyncadd (!%p1442_p11), %s1029_s29, 4294967168  ;;  %s1038_s25 = scalar_lea.sflag [#allocation7], %s1028_s20 }
 0x498   : > { %1598 = dma.done.wait (!%p1442_p11), %s1038_s25, 384  }
 0x499   : > { %1600 = vsyncadd (!%p1442_p11), %s1038_s25, 4294966912  ;;  %s2238_s13 = sld [smem:[#allocation11_spill]]  ;;  %s2239_s23 = sld [smem:[#allocation12_spill]] }
 0x49a   : > { %p27_p9 = scmp.ge.s32.totalorder %s1715_s27, 4   ;;  %s2240_s21 = smov %s1607_s22 }
 0x49b   : > { %s2242_s24 = smov %s1715_s27 }
 0x49c   :  { %29 = sbr.rel (!%p27_p9) target bundleno = 9 (0x9), region = 121 }
 0x49f   : > { %s2241_s22 = smov %s2238_s13 }
 0x4a3   :  { %1043 = vsyncpa [#allocation3], 1 }
 0x4a4   :  { %1045 = vsyncpa [#allocation3 + $0x1], 1 }
 0x4a5   :  { %1046 = vsyncpa [#allocation4], 1 }
 0x4a6   :  { %1048 = vsyncpa [#allocation4 + $0x1], 1 }
 0x4a7   :  { %1049 = vsyncpa [#allocation7], 1 }
 0x4a8   :  { %1051 = vsyncpa [#allocation7 + $0x1], 1 }

</bundles_post_ra>
